<compile_context>
chip_gen: v6e
topology: v6e:2x2x1
jax: 0.10.0
libtpu: 0.0.40
codegen_flags: <defaults>
</compile_context>

<pallas_src>
import jax
import jax.numpy as jnp
from jax.experimental import pallas as pl
from jax.experimental.pallas import tpu as pltpu


def _round_up(a, b):
    return (a + b - 1) // b * b


def _server_gcn_kernel(x_ref, w1_ref, b1_ref, w2_ref, b2_ref, out_ref):
    # fc1 (BatchNorm folded into weights/bias in the wrapper) + ReLU.
    # x arrives f32; cast to bf16 here so the cast hides under the tile DMA.
    h = jnp.dot(x_ref[...].astype(jnp.bfloat16), w1_ref[...],
                preferred_element_type=jnp.float32)
    h = jnp.maximum(h + b1_ref[...], 0.0)

    # dropout: identity in eval mode.
    # TODO(synk): training-mode dropout (PyTorch RNG stream) intentionally not reproduced.

    # fc2 computed transposed: (O, H) @ (H, tile_n) -> (O, tile_n).  Keeps the tiny
    # O=2 output lane-dense (no 128-col padded slab); XLU transpose cost is hidden.
    y_t = jnp.dot(w2_ref[...], h.T, preferred_element_type=jnp.float32)
    out_ref[...] = (y_t + b2_ref[...]).astype(out_ref.dtype)


def _pick_tile_n(n, max_tile_n):
    if n <= 256:
        # Single small tile; 16-row alignment keeps bf16 sublane packing clean.
        return _round_up(n, 16)
    # Multi-tile: lane dim of the transposed output block must be a multiple of 128.
    t = min(max_tile_n, _round_up(n, 128))
    # Guarantee >= 2 grid tiles so the "parallel" axis can shard across v7x's 2 TCs.
    if pl.cdiv(n, t) < 2:
        t = max(128, _round_up(pl.cdiv(n, 2), 128))
    return t


def server_gcn_forward(x, w1, b1, gamma, beta, running_mean, running_var, w2, b2,
                       *, eps=1e-5, max_tile_n=2048):
    """Eval-mode ServerGCN forward. x: (N, H); w1: (H, H); b1: (H,); w2: (O, H); b2: (O,)."""
    if x.dtype != jnp.float32:
        x = x.astype(jnp.float32)
    N, H = x.shape
    O = w2.shape[0]

    # ---- one-time folding of constant parameters (O(H^2) work) -------------
    # ((x @ W1^T + b1) - mean) * s + beta == x @ (W1^T * s) + ((b1 - mean) * s + beta)
    scale = jnp.asarray(gamma, jnp.float32) * jax.lax.rsqrt(
        jnp.asarray(running_var, jnp.float32) + jnp.float32(eps))
    w1f = (jnp.asarray(w1, jnp.float32).T * scale[None, :]).astype(jnp.bfloat16)
    b1f = ((jnp.asarray(b1, jnp.float32) - jnp.asarray(running_mean, jnp.float32)) * scale
           + jnp.asarray(beta, jnp.float32)).reshape(1, H)
    w2f = jnp.asarray(w2, jnp.float32)                     # (O, H), tiny & resident
    b2f = jnp.asarray(b2, jnp.float32).reshape(O, 1)

    # ---- batch tiling (no wrapper-side pad/cast of x) -----------------------
    tile_n = _pick_tile_n(N, max_tile_n)
    num_tiles = pl.cdiv(N, tile_n)
    n_grid = num_tiles * tile_n          # columns of the transposed output buffer

    cost = pl.CostEstimate(
        flops=2 * n_grid * H * (H + O),
        transcendentals=0,
        bytes_accessed=(N * H * 4 + w1f.size * 2 + w2f.size * 4
                        + (b1f.size + b2f.size) * 4 + O * n_grid * 4),
    )

    out_t = pl.pallas_call(
        _server_gcn_kernel,
        out_shape=jax.ShapeDtypeStruct((O, n_grid), jnp.float32),
        grid_spec=pltpu.PrefetchScalarGridSpec(
            num_scalar_prefetch=0,
            grid=(num_tiles,),
            in_specs=[
                pl.BlockSpec((tile_n, H), lambda i: (i, 0)),   # x tile (streamed, f32)
                pl.BlockSpec((H, H), lambda i: (0, 0)),        # folded W1^T (resident, bf16)
                pl.BlockSpec((1, H), lambda i: (0, 0)),        # folded fc1+BN bias (resident)
                pl.BlockSpec((O, H), lambda i: (0, 0)),        # W2 (resident, f32)
                pl.BlockSpec((O, 1), lambda i: (0, 0)),        # fc2 bias (resident)
            ],
            out_specs=pl.BlockSpec((O, tile_n), lambda i: (0, i)),
        ),
        compiler_params=pltpu.CompilerParams(
            dimension_semantics=("parallel",),   # megacore sharding on v7x
        ),
        cost_estimate=cost,
    )(x, w1f, b1f, w2f, b2f)

    # (O, n_grid) -> (N, O); touches only ~O*4 bytes per batch row.
    return out_t[:, :N].T


if __name__ == "__main__":
    hidden_channels = 64
    out_channels = 2
    batch = 8

    key = jax.random.PRNGKey(0)
    kx, kw1, kb1, kw2, kb2, kg, kbt, km, kv = jax.random.split(key, 9)

    x = jax.random.normal(kx, (batch, hidden_channels), jnp.float32)

    # Deterministic synthetic parameters (shapes from the PyTorch module).
    w1 = jax.random.normal(kw1, (hidden_channels, hidden_channels), jnp.float32) * 0.1
    b1 = jax.random.normal(kb1, (hidden_channels,), jnp.float32) * 0.1
    w2 = jax.random.normal(kw2, (out_channels, hidden_channels), jnp.float32) * 0.1
    b2 = jax.random.normal(kb2, (out_channels,), jnp.float32) * 0.1
    gamma = 1.0 + 0.05 * jax.random.normal(kg, (hidden_channels,), jnp.float32)
    beta = 0.05 * jax.random.normal(kbt, (hidden_channels,), jnp.float32)
    running_mean = 0.1 * jax.random.normal(km, (hidden_channels,), jnp.float32)
    running_var = 1.0 + 0.1 * jax.random.uniform(kv, (hidden_channels,), jnp.float32)

    out = server_gcn_forward(x, w1, b1, gamma, beta, running_mean, running_var, w2, b2)
    out = jax.block_until_ready(out)

    # Pure-JAX f32 reference (PyTorch eval-mode semantics). fc1 uses bf16 MXU inputs
    # with f32 accumulation (fc2 stays f32), so tolerance is loosened accordingly.
    h = x @ w1.T + b1
    h = (h - running_mean) * jax.lax.rsqrt(running_var + 1e-5) * gamma + beta
    h = jnp.maximum(h, 0.0)
    ref = h @ w2.T + b2
    assert out.shape == (batch, out_channels)
    assert jnp.allclose(out, ref, atol=5e-2, rtol=5e-2)

    print("KERNEL_OK")
</pallas_src>

<mosaic_0001>
module attributes {stable_mosaic.version = 11 : i64} {
  func.func @_server_gcn_kernel(%arg0: i32, %arg1: memref<16x64xf32, #tpu.memory_space<vmem>>, %arg2: memref<64x64xbf16, #tpu.memory_space<vmem>>, %arg3: memref<1x64xf32, #tpu.memory_space<vmem>>, %arg4: memref<2x64xf32, #tpu.memory_space<vmem>>, %arg5: memref<2x1xf32, #tpu.memory_space<vmem>>, %arg6: memref<2x16xf32, #tpu.memory_space<vmem>>) attributes {dimension_semantics = [#tpu.dimension_semantics<parallel>], iteration_bounds = array<i64: 1>, scalar_prefetch = 0 : i64, scratch_operands = 0 : i64, tpu.core_type = #tpu.core_type<tc>, window_params = [{transform_indices = @transform_0, window_bounds = array<i64: 16, 64>}, {pipeline_mode = #tpu.pipeline_mode<synchronous>, transform_indices = @transform_1, window_bounds = array<i64: 64, 64>}, {pipeline_mode = #tpu.pipeline_mode<synchronous>, transform_indices = @transform_2, window_bounds = array<i64: 1, 64>}, {pipeline_mode = #tpu.pipeline_mode<synchronous>, transform_indices = @transform_3, window_bounds = array<i64: 2, 64>}, {pipeline_mode = #tpu.pipeline_mode<synchronous>, transform_indices = @transform_4, window_bounds = array<i64: 2, 1>}, {transform_indices = @transform_5, window_bounds = array<i64: 2, 16>}]} {
    %c0 = arith.constant 0 : index
    %c0_0 = arith.constant 0 : index
    %0 = vector.load %arg1[%c0, %c0_0] : memref<16x64xf32, #tpu.memory_space<vmem>>, vector<16x64xf32>
    %1 = arith.truncf %0 : vector<16x64xf32> to vector<16x64xbf16>
    %c0_1 = arith.constant 0 : index
    %c0_2 = arith.constant 0 : index
    %2 = vector.load %arg2[%c0_1, %c0_2] : memref<64x64xbf16, #tpu.memory_space<vmem>>, vector<64x64xbf16>
    %cst = arith.constant dense<0.000000e+00> : vector<16x64xf32>
    %3 = tpu.matmul %1, %2, %cst {dimension_numbers = #tpu.dot_dimension_numbers<[1], [0], [0], [1], [0, 0, 1, 1], [], []>} : vector<16x64xbf16>, vector<64x64xbf16>, vector<16x64xf32> -> vector<16x64xf32>
    %c0_3 = arith.constant 0 : index
    %c0_4 = arith.constant 0 : index
    %4 = vector.load %arg3[%c0_3, %c0_4] : memref<1x64xf32, #tpu.memory_space<vmem>>, vector<1x64xf32>
    %5 = vector.broadcast %4 : vector<1x64xf32> to vector<16x64xf32>
    %6 = arith.addf %3, %5 : vector<16x64xf32>
    %cst_5 = arith.constant 0.000000e+00 : f32
    %7 = vector.broadcast %cst_5 : f32 to vector<16x64xf32>
    %8 = arith.maximumf %6, %7 : vector<16x64xf32>
    %c0_6 = arith.constant 0 : index
    %c0_7 = arith.constant 0 : index
    %9 = vector.load %arg4[%c0_6, %c0_7] : memref<2x64xf32, #tpu.memory_space<vmem>>, vector<2x64xf32>
    %10 = tpu.transpose %8, [1, 0] : vector<16x64xf32> -> vector<64x16xf32>
    %cst_8 = arith.constant dense<0.000000e+00> : vector<2x16xf32>
    %11 = tpu.matmul %9, %10, %cst_8 {dimension_numbers = #tpu.dot_dimension_numbers<[1], [0], [0], [1], [0, 0, 1, 1], [], []>} : vector<2x64xf32>, vector<64x16xf32>, vector<2x16xf32> -> vector<2x16xf32>
    %c0_9 = arith.constant 0 : index
    %c0_10 = arith.constant 0 : index
    %12 = vector.load %arg5[%c0_9, %c0_10] : memref<2x1xf32, #tpu.memory_space<vmem>>, vector<2x1xf32>
    %13 = vector.broadcast %12 : vector<2x1xf32> to vector<2x16xf32>
    %14 = arith.addf %11, %13 : vector<2x16xf32>
    %c0_11 = arith.constant 0 : index
    %c0_12 = arith.constant 0 : index
    %15 = vector.load %arg6[%c0_11, %c0_12] : memref<2x16xf32, #tpu.memory_space<vmem>>, vector<2x16xf32>
    tpu.vector_store %arg6[%c0_11, %c0_12], %14 {strides = array<i32>} : memref<2x16xf32, #tpu.memory_space<vmem>>, vector<2x16xf32>,
    return
  }
  func.func @transform_0(%arg0: i32) -> (i32, i32) {
    %c0_i32 = arith.constant 0 : i32
    %c0_i32_0 = arith.constant 0 : i32
    return %arg0, %c0_i32 : i32, i32
  }
  func.func @transform_1(%arg0: i32) -> (i32, i32) {
    %c0_i32 = arith.constant 0 : i32
    %c0_i32_0 = arith.constant 0 : i32
    %c0_i32_1 = arith.constant 0 : i32
    return %c0_i32, %c0_i32_0 : i32, i32
  }
  func.func @transform_2(%arg0: i32) -> (i32, i32) {
    %c0_i32 = arith.constant 0 : i32
    %c0_i32_0 = arith.constant 0 : i32
    %c0_i32_1 = arith.constant 0 : i32
    return %c0_i32, %c0_i32_0 : i32, i32
  }
  func.func @transform_3(%arg0: i32) -> (i32, i32) {
    %c0_i32 = arith.constant 0 : i32
    %c0_i32_0 = arith.constant 0 : i32
    %c0_i32_1 = arith.constant 0 : i32
    return %c0_i32, %c0_i32_0 : i32, i32
  }
  func.func @transform_4(%arg0: i32) -> (i32, i32) {
    %c0_i32 = arith.constant 0 : i32
    %c0_i32_0 = arith.constant 0 : i32
    %c0_i32_1 = arith.constant 0 : i32
    return %c0_i32, %c0_i32_0 : i32, i32
  }
  func.func @transform_5(%arg0: i32) -> (i32, i32) {
    %c0_i32 = arith.constant 0 : i32
    %c0_i32_0 = arith.constant 0 : i32
    return %c0_i32, %arg0 : i32, i32
  }
}

</mosaic_0001>

<bundles_post_ra>
// kernel: tpu_custom_call.1
= control target key start
LH: loop header
LB: loop body
LE: loop exit
PB: predicated region body
PF: predicated region fallthrough
CT: control target
= control target key end

     0   :  { %10 = vsyncpa [#allocation3], 0  ;;  %s422_s0 = inlined_call_operand.hbm [shape: f32[8,64], index: 0, kind: input, shape index: {}]   ;;  %s423_s1 = inlined_call_operand.hbm [shape: bf16[64,64], index: 1, kind: input, shape index: {}]   ;;  %s424_s2 = inlined_call_operand.vmem [shape: f32[1,64], index: 2, kind: input, shape index: {}]   ;;  %s425_s3 = inlined_call_operand.vmem [shape: f32[2,64], index: 3, kind: input, shape index: {}]   ;;  %s426_s4 = inlined_call_operand.vmem [shape: f32[2,1], index: 4, kind: input, shape index: {}]   ;;  %s427_s5 = inlined_call_operand.hbm [shape: f32[2,16], index: 5, kind: output, shape index: {}]  }
   0x1   :  { %11 = vsyncpa [#allocation6], 0 }
   0x2   :  { %12 = vsyncpa [#allocation4], 0 }
   0x3   :  { %17 = vsyncadd [#allocation3], 128  ;;  %s360_s18 = smov [#allocation2]  }
   0x4   :  { %s18_s19 = sshll.u32 %s360_s18, 4  ;;  %s19_s19 = int_to_ptr.vmem [resolvable:$true] %s18_s19 }
   0x5   :  { %s302_s20 = scalar_lea.vmem %s19_s19, 128  ;;  %s306_s21 = scalar_lea.vmem %s19_s19, 256 }
   0x6   :  { %p303_p0 = scmp.ne.s32.totalorder %s19_s19, %s302_s20  ;;  %p307_p1 = scmp.lt.s32.totalorder %s19_s19, %s19_s19 }
   0x7   :  { %p308_p2 = scmp.lt.s32.totalorder %s306_s21, %s302_s20 }
   0x9   :  { %p309_p3 = por %p308_p2, %p307_p1 }
   0xb   :  { %p310_p4 = pnand %p309_p3, %p303_p0 }
   0xd   :  { %313 = shalt.err (!%p310_p4)
}
   0xe   :  { %s361_s22 = smov 128   ;;  %s362_s23 = smov 8  }
   0xf   :  { %24 = dma.hbm_to_vmem [thread:$0]  %s422_s0, 128, %s19_s19, [#allocation3], %s361_s22, %s361_s22, %s362_s23  }
  0x10   :  { %s363_s26 = smov [#allocation5]  }
  0x11   :  { %s30_s27 = sshll.u32 %s363_s26, 4  ;;  %s31_s27 = int_to_ptr.vmem [resolvable:$true] %s30_s27 }
  0x12   :  { %s322_s28 = scalar_lea.vmem %s31_s27, 512  ;;  %p327_p6 = scmp.lt.s32.totalorder %s31_s27, %s31_s27 }
  0x13   :  { %p323_p5 = scmp.ne.s32.totalorder %s31_s27, %s322_s28  ;;  %p328_p7 = scmp.lt.s32.totalorder %s322_s28, %s322_s28 }
  0x15   :  { %p329_p8 = por %p328_p7, %p327_p6 }
  0x17   :  { %p330_p9 = pnand %p329_p8, %p323_p5 }
  0x19   :  { %333 = shalt.err (!%p330_p9)
}
  0x1a   :  { %s364_s29 = smov 64   ;;  %s365_s30 = smov 4  }
  0x1b   :  { %36 = dma.hbm_to_vmem [thread:$0]  %s423_s1, 512, %s31_s27, [#allocation6], %s364_s29, %s364_s29, %s365_s30  }
  0x1c   :  { %354 = dma.done.wait [#allocation3], 256  }
  0x1d   :  { %355 = vsyncadd [#allocation3], 4294967040 }
  0x1e   :  { %356 = dma.done.wait [#allocation6], 512  }
  0x1f   :  { %357 = vsyncadd [#allocation6], 4294966784  ;;  %v366_v0 = vmov 0.0   ;;  %vm367_vm0 = vmmov 0   ;;  %v290_v1 = vld [vmem:[#allocation5 + $0x18] sm:$0xff]   ;;  %v291_v2 = vld [vmem:[#allocation5 + $0x10] sm:$0xff]  }
  0x20   :  { %260 = vmatprep.subr.bf16.mxu0 %v366_v0  ;;  %268 = vmatprep.mubr.msk.bf16.mxu0 %vm367_vm0, %v366_v0  ;;  %v292_v3 = vld [vmem:[#allocation5 + $0x8] sm:$0xff]   ;;  %v293_v4 = vld [vmem:[#allocation5] sm:$0xff]   ;;  %v50_v5 = vld [vmem:[#allocation2] sm:$0xff]  ;;  %vm92_vm1 = vcmask 523264   ;;  %v368_v9 = vmov 0   ;;  %s369_s11 = smov [#allocation7]  }
  0x21   :  { %272 = vmatprep.subr.mxu1 %v366_v0  ;;  %276 = vmatprep.mubr.msk.f32.mxu1 %vm367_vm0, %v366_v0  ;;  %v51_v6 = vld [vmem:[#allocation2 + $0x8] sm:$0xff]  ;;  %v140_v8 = vld [vmem:[%s426_s4] sm:$0x3]  ;;  %vm225_vm2 = vcmask 123904  }
  0x22   :  { %261 = vmatpush3.bf16.msra.mxu0 %v290_v1  ;;  %v52_v7 = vpack.c.bf16 %v51_v6, %v50_v5  ;;  %289 = vset.pattern.permute.xlu0 %v368_v9  ;;  %v243_v12 = vld [vmem:[%s424_s2] ss:$0 sm:$0xff]  ;;  %s233_s2 = sshll.u32 %s369_s11, 4  ;;  %s234_s2 = int_to_ptr.vmem [resolvable:$true] %s233_s2 }
  0x23   :  { %262 = vmatprep.subr.bf16.mxu0 %v366_v0  ;;  %143 = vperm.xlu0 %289, %v140_v8   ;;  %v139_v19 = vld [vmem:[%s425_s3] sm:$0x3]  ;;  %s334_s12 = scalar_lea.vmem %s234_s2, 32  ;;  %p339_p11 = scmp.lt.s32.totalorder %s234_s2, %s234_s2 }
  0x24   :  { %p335_p10 = scmp.ne.s32.totalorder %s234_s2, %s334_s12  ;;  %p340_p12 = scmp.lt.s32.totalorder %s334_s12, %s334_s12 }
  0x26   :  { %263 = vmatpush3.bf16.msra.mxu0 %v291_v2  ;;  %p341_p13 = por %p340_p12, %p339_p11 }
  0x27   :  { %264 = vmatprep.subr.bf16.mxu0 %v366_v0 }
  0x28   :  { %p342_p0 = pnand %p341_p13, %p335_p10 }
  0x2a   :  { %265 = vmatpush3.bf16.msra.mxu0 %v292_v3 }
  0x2b   :  { %266 = vmatprep.subr.bf16.mxu0 %v366_v0 }
  0x2e   :  { %267 = vmatpush3.bf16.msra.mxu0 %v293_v4 }
  0x31   :  { %269 = vmatmul.mubr.msk.bf16.vlgmr.msra.gmra.mxu0 %vm92_vm1, %v52_v7 }
  0x9e   :  { %v144_v20 = vpop.permute.xlu0 %143 }
  0xf1   :  { %v130_v10 = vpop.f32.mrf.mxu0 }
  0xf2   :  { %v131_v16 = vadd.f32 %v243_v12, %v130_v10 }
  0xf3   :  { %v270_v11 = vpop.f32.mrf.mxu0 }
  0xf4   :  { %v137_v18 = vmax.f32 %v131_v16, 0.0 }
  0xf5   :  { %v133_v13 = vpop.f32.mrf.mxu0 }
  0xf6   :  { %v134_v14 = vadd.f32 %v243_v12, %v133_v13 }
  0xf7   :  { %v271_v15 = vpop.f32.mrf.mxu0 }
  0xf8   :  { %v138_v17 = vmax.f32 %v134_v14, 0.0 }
  0xfa   :  { %273 = vmatpush3.xpose.msk.msra.mxu1 %vm92_vm1, %v138_v17 }
  0xfb   :  { %274 = vmatprep.subr.mxu1 %v366_v0 }
  0xfe   :  { %275 = vmatpush3.xpose.msk.msra.mxu1 %vm92_vm1, %v137_v18 }
 0x101   :  { %277 = vmatmul.mubr.msk.f32.vlgmr.msra.gmra.mxu1 %vm92_vm1, %v139_v19 }
 0x1c1   :  { %v221_v21 = vpop.f32.mrf.mxu1 }
 0x1c2   :  { %v222_v22 = vadd.f32 %v221_v21, %v144_v20 }
 0x1c3   :  { %v278_v23 = vpop.f32.mrf.mxu1 }
 0x1c4   :  { %226 = vst.msk [vmem:[#allocation7] sm:$0x3] %vm225_vm2, %v222_v22 }
 0x1c5   :  { %345 = shalt.err (!%p342_p0)
}
 0x1c6   :  { %236 = dma.vmem_to_hbm [thread:$0]  %s234_s2, 32, %s427_s5, [#allocation4]  }
 0x1c7   :  { %358 = dma.done.wait [#allocation4], 32  }
 0x1c8   :  { %359 = vsyncadd [#allocation4], 4294967264 }
 0x1c9   :  { %240 = vsyncpa [#allocation3], 1 }
 0x1ca   :  { %241 = vsyncpa [#allocation6], 1 }
 0x1cb   :  { %242 = vsyncpa [#allocation4], 1 }

</bundles_post_ra>
